<compile_context>
chip_gen: v7x
topology: tpu7x:2x2x1
jax: 0.10.0
libtpu: 0.0.40
codegen_flags: <defaults>
</compile_context>

<pallas_src>
import jax
import jax.numpy as jnp
from jax.experimental import pallas as pl
from jax.experimental.pallas import tpu as pltpu


def _sandwich_kernel(w1f_ref, w1r_ref, w2_ref, inp_ref, rays_ref, out_ref):
    # w1f_ref: (6, 9)   mlp1 weights vs. the full 9-channel input block
    #                   (columns 0:3 — the albedo channels — are zero)
    # w1r_ref: (6, 6)   mlp1 weights vs. the 6 ray channels
    # w2_ref:  (3, 6)   mlp2 weights
    # inp_ref: (1, 9, TP)  NCHW slab, pixels flattened onto lanes
    # rays_ref:(1, 6, TP)
    # out_ref: (1, 3, TP)
    feats = inp_ref[0]                     # (9, TP)
    rays = rays_ref[0]                     # (6, TP)

    # mlp1 over the virtual [spec, timefeature, rays] concat, as a split
    # contraction.  Zero-padded albedo columns make the first dot exact
    # against the full 9-row tile — no sublane-tile-crossing slice needed.
    h = (jnp.dot(w1f_ref[...], feats, preferred_element_type=jnp.float32)
         + jnp.dot(w1r_ref[...], rays, preferred_element_type=jnp.float32))
    h = jnp.maximum(h, 0.0)                                            # ReLU
    s = jnp.dot(w2_ref[...], h, preferred_element_type=jnp.float32)    # (3, TP)

    albedo = feats[0:3, :].astype(jnp.float32)   # sublane-aligned slice (rows 0..2)
    x = albedo + s

    # sigmoid(x) = 1 / (1 + exp(-x)); keep the divide on the EUP slot.
    denom = 1.0 + jnp.exp(-x)
    r = pl.reciprocal(denom, approx=True)
    r = r * (2.0 - denom * r)                    # one Newton step -> ~f32-exact
    out_ref[0] = r.astype(out_ref.dtype)


def _pick_tile(n, hw, max_tile=32768, min_grid_steps=4):
    """Choose the lane-axis pixel tile.

    Returns a tile that is either the full H*W (always a legal block) or a
    multiple of 128.  The grid uses cdiv(hw, tile): a ragged last block is
    masked by Pallas, which is safe because compute is per-pixel.  For small
    batches the tile is capped so the parallel grid has >= min_grid_steps
    steps (keeps both v7x TensorCores busy)."""
    max_tile = max(128, max_tile - max_tile % 128)

    if n < min_grid_steps and hw > 128:
        want = -(-min_grid_steps // n)                       # tiles per image
        cap = -(-(-(-hw // want)) // 128) * 128              # ceil(hw/want) -> x128
        max_tile = min(max_tile, max(128, cap))

    if hw <= max_tile:
        return hw                                            # full-dim block
    # Prefer an exact multiple-of-128 divisor (no ragged tail) ...
    for t in range(max_tile, 0, -128):
        if hw % t == 0:
            return t
    # ... otherwise a fixed 128-multiple tile; cdiv grid masks the ragged tail.
    return max_tile


def sandwich_forward(inp, rays, w1, w2, *, max_tile=32768, out_dtype=None):
    """inp: [N, 9, H, W], rays: [N, 6, H, W], w1: [6,12,1,1], w2: [3,6,1,1].

    Pass bf16 inp/rays (and out_dtype=jnp.bfloat16) to halve HBM traffic on
    bandwidth-bound chips; accumulation is always f32 inside the kernel."""
    N, C, H, W = inp.shape
    assert C == 9 and rays.shape == (N, 6, H, W)
    HW = H * W
    out_dtype = out_dtype if out_dtype is not None else inp.dtype

    # Free (contiguous) reshapes — no transpose, no concat, no extra HBM pass.
    inp3 = inp.reshape(N, 9, HW)
    rays3 = rays.reshape(N, 6, HW)

    # 1x1 conv weights [C_out, C_in, 1, 1] -> [C_out, C_in].
    w1_m = w1[:, :, 0, 0].astype(jnp.float32)                       # (6, 12)
    # Columns acting on [spec, timefeature], zero-padded over the albedo
    # channels so the kernel can contract against the full 9-channel block.
    w1f = jnp.concatenate(
        [jnp.zeros((6, 3), jnp.float32), w1_m[:, 0:6]], axis=1)     # (6, 9)
    w1r = w1_m[:, 6:12]                                             # (6, 6)
    w2_m = w2[:, :, 0, 0].astype(jnp.float32)                       # (3, 6)

    tile_p = _pick_tile(N, HW, max_tile)
    num_tiles = pl.cdiv(HW, tile_p)
    grid = (N, num_tiles)

    in_bytes = jnp.dtype(inp.dtype).itemsize
    out_bytes = jnp.dtype(out_dtype).itemsize
    cost = pl.CostEstimate(
        flops=N * HW * 216,                  # 2*(6*9 + 6*6 + 3*6) per pixel
        transcendentals=N * HW * 6,          # exp + reciprocal per output chan
        bytes_accessed=N * HW * (15 * in_bytes + 3 * out_bytes),
    )

    out = pl.pallas_call(
        _sandwich_kernel,
        out_shape=jax.ShapeDtypeStruct((N, 3, HW), out_dtype),
        grid_spec=pltpu.PrefetchScalarGridSpec(
            num_scalar_prefetch=0,
            grid=grid,
            in_specs=[
                # Tiny weights: constant block index -> fetched once, resident.
                pl.BlockSpec((6, 9), lambda n, t: (0, 0)),
                pl.BlockSpec((6, 6), lambda n, t: (0, 0)),
                pl.BlockSpec((3, 6), lambda n, t: (0, 0)),
                pl.BlockSpec((1, 9, tile_p), lambda n, t: (n, 0, t)),
                pl.BlockSpec((1, 6, tile_p), lambda n, t: (n, 0, t)),
            ],
            out_specs=pl.BlockSpec((1, 3, tile_p), lambda n, t: (n, 0, t)),
        ),
        compiler_params=pltpu.CompilerParams(
            dimension_semantics=("parallel", "parallel"),
            vmem_limit_bytes=48 * 1024 * 1024,   # headroom for 32K-pixel tiles
        ),
        cost_estimate=cost,
    )(w1f, w1r, w2_m, inp3, rays3)

    # Free reshape back to NCHW.
    return out.reshape(N, 3, H, W)


def sandwich_reference(inp, rays, w1, w2):
    """Pure-JAX reference matching the PyTorch forward."""
    albedo = inp[:, 0:3]
    spec = inp[:, 3:6]
    timefeature = inp[:, 6:9]
    x = jnp.concatenate([spec, timefeature, rays], axis=1)            # [N, 12, H, W]
    h = jnp.einsum('nchw,oc->nohw', x, w1[:, :, 0, 0])                # 1x1 conv
    h = jnp.maximum(h, 0.0)
    s = jnp.einsum('nchw,oc->nohw', h, w2[:, :, 0, 0])
    return jax.nn.sigmoid(albedo + s)


def _check(key, N, H, W, w1, w2):
    k_in, k_rays = jax.random.split(key)
    inp = jax.random.normal(k_in, (N, 9, H, W), dtype=jnp.float32)
    rays = jax.random.normal(k_rays, (N, 6, H, W), dtype=jnp.float32)

    out = sandwich_forward(inp, rays, w1, w2)
    out = jax.block_until_ready(out)

    ref = sandwich_reference(inp, rays, w1, w2)
    assert out.shape == (N, 3, H, W)
    assert jnp.allclose(out, ref, atol=1e-5, rtol=1e-5), \
        f"mismatch vs reference for shape {(N, H, W)}"


if __name__ == "__main__":
    key = jax.random.PRNGKey(0)
    k_a, k_b, k_w1, k_w2 = jax.random.split(key, 4)

    # Deterministic Conv2d(12,6,1,bias=False) / Conv2d(6,3,1,bias=False) weights.
    w1 = 0.1 * jax.random.normal(k_w1, (6, 12, 1, 1), dtype=jnp.float32)
    w2 = 0.1 * jax.random.normal(k_w2, (3, 6, 1, 1), dtype=jnp.float32)

    # Small, evenly-tiled case (exercises the multi-step parallel grid).
    _check(k_a, N=2, H=16, W=16, w1=w1, w2=w2)
    # Odd resolution (exercises the cdiv grid with a masked ragged last block).
    _check(k_b, N=1, H=20, W=25, w1=w1, w2=w2)

    print("KERNEL_OK")
</pallas_src>

<mosaic_0001>
module attributes {stable_mosaic.version = 11 : i64} {
  func.func @_sandwich_kernel(%arg0: i32, %arg1: i32, %arg2: memref<6x9xf32, #tpu.memory_space<vmem>>, %arg3: memref<6x6xf32, #tpu.memory_space<vmem>>, %arg4: memref<3x6xf32, #tpu.memory_space<vmem>>, %arg5: memref<1x9x128xf32, #tpu.memory_space<vmem>>, %arg6: memref<1x6x128xf32, #tpu.memory_space<vmem>>, %arg7: memref<1x3x128xf32, #tpu.memory_space<vmem>>) attributes {dimension_semantics = [#tpu.dimension_semantics<parallel>, #tpu.dimension_semantics<parallel>], iteration_bounds = array<i64: 2, 2>, scalar_prefetch = 0 : i64, scratch_operands = 0 : i64, tpu.core_type = #tpu.core_type<tc>, window_params = [{pipeline_mode = #tpu.pipeline_mode<synchronous>, transform_indices = @transform_0, window_bounds = array<i64: 6, 9>}, {pipeline_mode = #tpu.pipeline_mode<synchronous>, transform_indices = @transform_1, window_bounds = array<i64: 6, 6>}, {pipeline_mode = #tpu.pipeline_mode<synchronous>, transform_indices = @transform_2, window_bounds = array<i64: 3, 6>}, {transform_indices = @transform_3, window_bounds = array<i64: 1, 9, 128>}, {transform_indices = @transform_4, window_bounds = array<i64: 1, 6, 128>}, {transform_indices = @transform_5, window_bounds = array<i64: 1, 3, 128>}]} {
    %c0 = arith.constant 0 : index
    %c0_0 = arith.constant 0 : index
    %c0_1 = arith.constant 0 : index
    %0 = vector.load %arg5[%c0, %c0_0, %c0_1] : memref<1x9x128xf32, #tpu.memory_space<vmem>>, vector<1x9x128xf32>
    %1 = vector.shape_cast %0 : vector<1x9x128xf32> to vector<9x128xf32>
    %c0_2 = arith.constant 0 : index
    %c0_3 = arith.constant 0 : index
    %c0_4 = arith.constant 0 : index
    %2 = vector.load %arg6[%c0_2, %c0_3, %c0_4] : memref<1x6x128xf32, #tpu.memory_space<vmem>>, vector<1x6x128xf32>
    %3 = vector.shape_cast %2 : vector<1x6x128xf32> to vector<6x128xf32>
    %c0_5 = arith.constant 0 : index
    %c0_6 = arith.constant 0 : index
    %4 = vector.load %arg2[%c0_5, %c0_6] : memref<6x9xf32, #tpu.memory_space<vmem>>, vector<6x9xf32>
    %cst = arith.constant dense<0.000000e+00> : vector<6x128xf32>
    %5 = tpu.matmul %4, %1, %cst {dimension_numbers = #tpu.dot_dimension_numbers<[1], [0], [0], [1], [0, 0, 1, 1], [], []>} : vector<6x9xf32>, vector<9x128xf32>, vector<6x128xf32> -> vector<6x128xf32>
    %c0_7 = arith.constant 0 : index
    %c0_8 = arith.constant 0 : index
    %6 = vector.load %arg3[%c0_7, %c0_8] : memref<6x6xf32, #tpu.memory_space<vmem>>, vector<6x6xf32>
    %cst_9 = arith.constant dense<0.000000e+00> : vector<6x128xf32>
    %7 = tpu.matmul %6, %3, %cst_9 {dimension_numbers = #tpu.dot_dimension_numbers<[1], [0], [0], [1], [0, 0, 1, 1], [], []>} : vector<6x6xf32>, vector<6x128xf32>, vector<6x128xf32> -> vector<6x128xf32>
    %8 = arith.addf %5, %7 : vector<6x128xf32>
    %cst_10 = arith.constant 0.000000e+00 : f32
    %9 = vector.broadcast %cst_10 : f32 to vector<6x128xf32>
    %10 = arith.maximumf %8, %9 : vector<6x128xf32>
    %c0_11 = arith.constant 0 : index
    %c0_12 = arith.constant 0 : index
    %11 = vector.load %arg4[%c0_11, %c0_12] : memref<3x6xf32, #tpu.memory_space<vmem>>, vector<3x6xf32>
    %cst_13 = arith.constant dense<0.000000e+00> : vector<3x128xf32>
    %12 = tpu.matmul %11, %10, %cst_13 {dimension_numbers = #tpu.dot_dimension_numbers<[1], [0], [0], [1], [0, 0, 1, 1], [], []>} : vector<3x6xf32>, vector<6x128xf32>, vector<3x128xf32> -> vector<3x128xf32>
    %13 = vector.extract_strided_slice %1 {offsets = [0, 0], sizes = [3, 128], strides = [1, 1]} : vector<9x128xf32> to vector<3x128xf32>
    %14 = arith.addf %13, %12 : vector<3x128xf32>
    %cst_14 = arith.constant 0.000000e+00 : f32
    %15 = vector.broadcast %cst_14 : f32 to vector<3x128xf32>
    %16 = arith.subf %15, %14 : vector<3x128xf32>
    %17 = math.exp %16 : vector<3x128xf32>
    %cst_15 = arith.constant 1.000000e+00 : f32
    %18 = vector.broadcast %cst_15 : f32 to vector<3x128xf32>
    %19 = arith.addf %18, %17 : vector<3x128xf32>
    %20 = tpu.reciprocal %19 {approx = true} : vector<3x128xf32> -> vector<3x128xf32>
    %21 = arith.mulf %19, %20 : vector<3x128xf32>
    %cst_16 = arith.constant 2.000000e+00 : f32
    %22 = vector.broadcast %cst_16 : f32 to vector<3x128xf32>
    %23 = arith.subf %22, %21 : vector<3x128xf32>
    %24 = arith.mulf %20, %23 : vector<3x128xf32>
    %c0_17 = arith.constant 0 : index
    %c0_18 = arith.constant 0 : index
    %c0_19 = arith.constant 0 : index
    %25 = vector.load %arg7[%c0_17, %c0_18, %c0_19] : memref<1x3x128xf32, #tpu.memory_space<vmem>>, vector<1x3x128xf32>
    %26 = vector.shape_cast %25 : vector<1x3x128xf32> to vector<3x128xf32>
    %27 = vector.shape_cast %24 : vector<3x128xf32> to vector<1x3x128xf32>
    tpu.vector_store %arg7[%c0_17, %c0_18, %c0_19], %27 {strides = array<i32>} : memref<1x3x128xf32, #tpu.memory_space<vmem>>, vector<1x3x128xf32>,
    return
  }
  func.func @transform_0(%arg0: i32, %arg1: i32) -> (i32, i32) {
    %c0_i32 = arith.constant 0 : i32
    %c0_i32_0 = arith.constant 0 : i32
    %c0_i32_1 = arith.constant 0 : i32
    return %c0_i32, %c0_i32_0 : i32, i32
  }
  func.func @transform_1(%arg0: i32, %arg1: i32) -> (i32, i32) {
    %c0_i32 = arith.constant 0 : i32
    %c0_i32_0 = arith.constant 0 : i32
    %c0_i32_1 = arith.constant 0 : i32
    return %c0_i32, %c0_i32_0 : i32, i32
  }
  func.func @transform_2(%arg0: i32, %arg1: i32) -> (i32, i32) {
    %c0_i32 = arith.constant 0 : i32
    %c0_i32_0 = arith.constant 0 : i32
    %c0_i32_1 = arith.constant 0 : i32
    return %c0_i32, %c0_i32_0 : i32, i32
  }
  func.func @transform_3(%arg0: i32, %arg1: i32) -> (i32, i32, i32) {
    %c0_i32 = arith.constant 0 : i32
    %c0_i32_0 = arith.constant 0 : i32
    return %arg0, %c0_i32, %arg1 : i32, i32, i32
  }
  func.func @transform_4(%arg0: i32, %arg1: i32) -> (i32, i32, i32) {
    %c0_i32 = arith.constant 0 : i32
    %c0_i32_0 = arith.constant 0 : i32
    return %arg0, %c0_i32, %arg1 : i32, i32, i32
  }
  func.func @transform_5(%arg0: i32, %arg1: i32) -> (i32, i32, i32) {
    %c0_i32 = arith.constant 0 : i32
    %c0_i32_0 = arith.constant 0 : i32
    return %arg0, %c0_i32, %arg1 : i32, i32, i32
  }
}

</mosaic_0001>

<bundles_post_ra>
// kernel: tpu_custom_call.1
= control target key start
LH: loop header
LB: loop body
LE: loop exit
PB: predicated region body
PF: predicated region fallthrough
CT: control target
= control target key end

     0   :  { %s878_s18 = smov 0   ;;  %s880_s19 = smov 0   ;;  %s992_s0 = inlined_call_operand.vmem [shape: f32[6,9], index: 0, kind: input, shape index: {}]   ;;  %s993_s1 = inlined_call_operand.vmem [shape: f32[6,6], index: 1, kind: input, shape index: {}]   ;;  %s994_s2 = inlined_call_operand.vmem [shape: f32[3,6], index: 2, kind: input, shape index: {}]   ;;  %s995_s3 = inlined_call_operand.vmem [shape: f32[2,9,256], index: 3, kind: input, shape index: {}]   ;;  %s996_s4 = inlined_call_operand.vmem [shape: f32[2,6,256], index: 4, kind: input, shape index: {}]   ;;  %s997_s5 = inlined_call_operand.vmem [shape: f32[2,3,256], index: 5, kind: output, shape index: {}]  }
   0x1   :  { %s882_s20 = smov 0   ;;  %s884_s21 = smov 0  }
   0x2   :  { %s886_s22 = smov 0   ;;  %s888_s23 = smov 0  }
   0x3   :  { %s890_s24 = smov 0  }
   0x4 LB: > { %s24_s25 = sadd.s32 1, %s834_s22  ;;  %s27_s26 = sadd.s32 1, %s838_s23  ;;  %s842_s24 = sphi %s890_s24, %s15_s24   ;;  %s838_s23 = sphi %s888_s23, %s1003_s23   ;;  %s834_s22 = sphi %s886_s22, %s1002_s22   ;;  %s830_s21 = sphi %s884_s21, %s1001_s21   ;;  %s826_s20 = sphi %s882_s20, %s1000_s20   ;;  %s822_s19 = sphi %s880_s19, %s999_s19   ;;  %s818_s18 = sphi %s878_s18, %s998_s18  }
   0x5   : > { %p25_p0 = scmp.ge.s32.totalorder %s24_s25, 2  ;;  %p106_p1 = scmp.ne.s32.totalorder %s822_s19, %s818_s18 }
   0x6   : > { %p107_p2 = scmp.eq.s32.totalorder %s842_s24, 0  ;;  %s99_s30 = sadd.s32 1, %s822_s19 }
   0x7   : > { %s1005_s25 = smov (%p25_p0, %s24_s25), 0  ;;  %s1007_s26 = smov (!%p25_p0, %s27_s26), %s838_s23 }
   0x8   : > { %p108_p3 = por %p107_p2, %p106_p1  ;;  %p29_p4 = scmp.ge.s32.totalorder %s1007_s26, 2 }
   0x9   : > { %s95_s27 = ssub.s32 %s834_s22, %s1005_s25  ;;  %p676_p6 = scmp.ge.s32.totalorder %s842_s24, 4 }
   0xa   : > { %s1009_s26 = smov (%p29_p4, %s1007_s26), 0 }
   0xb   : > { %s94_s28 = ssub.s32 %s838_s23, %s1009_s26  ;;  %197 = sbr.rel (%p676_p6) target bundleno = 25 (0x19), region = 28 }
   0xc   : > { %s96_s29 = sor.u32 %s95_s27, %s94_s28 }
   0xd   : > { %p97_p5 = scmp.eq.s32.totalorder %s96_s29, 0 }
   0xf   : > { %s929_s6 = scalar_select %p97_p5, %s822_s19, %s99_s30  }
  0x12   : > { %200 = sbr.rel (!%p108_p3) target bundleno = 25 (0x19), region = 32  ;;  %s202_s7 = sand.u32 (%p108_p3), 1, %s822_s19  }
  0x13   : > { %s678_s8 = sshll.u32 (%p108_p3), %s838_s23, 2  ;;  %s677_s9 = sshll.u32 (%p108_p3), %s202_s7, 4 }
  0x14   : > { %s206_s10 = sadd.s32 (%p108_p3), %s834_s22, %s678_s8  ;;  %s204_s15 = scalar_lea.vmem (%p108_p3), [#allocation2], %s677_s9 }
  0x15   : > { %s679_s11 = sshll.u32 (%p108_p3), %s206_s10, 3 }
  0x16   : > { %s208_s14 = scalar_lea.vmem (%p108_p3), %s995_s3, %s679_s11 }
  0x17   : > { %v238_v0 = vld [vmem:[%s208_s14] sm:$0xff] (%p108_p3)  ;;  %v240_v1 = vld [vmem:[%s208_s14 + $0x10] sm:$0xff] (%p108_p3) }
  0x18   : > { %239 = vst [vmem:[%s204_s15] sm:$0xff] (%p108_p3), %v238_v0  ;;  %241 = vst [vmem:[%s204_s15 + $0x8] sm:$0xff] (%p108_p3), %v240_v1 }
  0x19 PF: > { %p680_p7 = scmp.ge.s32.totalorder %s842_s24, 1  ;;  %p257_p8 = scmp.lt.s32.totalorder %s842_s24, 5 }
  0x1b   : > { %p258_p9 = pnand %p680_p7, %p257_p8 }
  0x1c   : > { %p302_p10 = scmp.lt.s32.totalorder (!%p258_p9), %s830_s21, 1  ;;  %p304_p11 = scmp.lt.s32.totalorder (!%p258_p9), %s826_s20, 1  ;;  %v844_v2 = vmov (!%p258_p9), 0.0   ;;  %vm845_vm0 = vmmov (!%p258_p9), 0   ;;  %vm405_vm1 = vcmask (!%p258_p9), 1040384   ;;  %vm327_vm2 = vcmask (!%p258_p9), 1045504  }
  0x1d   : > { %261 = sbr.rel (%p258_p9) target bundleno = 515 (0x203), region = 74  ;;  %701 = vmatprep.subr.mxu0 (!%p258_p9), %v844_v2  ;;  %703 = vmatprep.mubr.msk.f32.mxu0 (!%p258_p9), %vm845_vm0, %v844_v2  ;;  %s264_s16 = sand.u32 (!%p258_p9), 1, %s818_s18   ;;  %v322_v5 = vld [vmem:[%s993_s1] sm:$0x3f] (!%p258_p9)  ;;  %vm323_vm3 = vcmask (!%p258_p9), 48128   ;;  %vm846_vm4 = vmmov (!%p258_p9), 1  }
  0x1e   : > { %713 = vmatprep.subr.mxu1 (!%p258_p9), %v844_v2  ;;  %715 = vmatprep.mubr.msk.f32.mxu1 (!%p258_p9), %vm845_vm0, %v844_v2  ;;  %s681_s27 = sshll.u32 (!%p258_p9), %s264_s16, 4  ;;  %vm720_vm5 = vmpackc.low (!%p258_p9), %vm405_vm1, %vm846_vm4  ;;  %v847_v8 = vmov (!%p258_p9), 0.0|0.0   ;;  %v321_v9 = vld [vmem:[%s992_s0] sm:$0x3f] (!%p258_p9)  ;;  %vm401_vm6 = vcmask (!%p258_p9), 72704  }
  0x1f   : > { %s266_s30 = scalar_lea.vmem (!%p258_p9), [#allocation2], %s681_s27  ;;  %v480_v13 = vld [vmem:[%s994_s2] sm:$0x7] (!%p258_p9) }
  0x20   : > { %v318_v3 = vld [vmem:[%s266_s30] sm:$0xff] (!%p258_p9)  ;;  %v319_v4 = vld [vmem:[%s266_s30 + $0x8] sm:$0x1] (!%p258_p9) }
  0x21   : > { %v719_v6 = vpack.c.bf16 (!%p258_p9), %v319_v4, %v318_v3 }
  0x24   : > { %s1011_s21 = smov (!%p302_p10, %s830_s21), 1  ;;  %s1013_s20 = smov (!%p304_p11, %s826_s20), 1 }
  0x25   : > { %s682_s17 = sshll.u32 %s1011_s21, 1 }
  0x26   : > { %s947_s28 = sadd.s32 %s682_s17, %s1013_s20 }
  0x27   : > { %s683_s29 = sshll.u32 %s947_s28, 3  ;;  %s685_s13 = sshll.u32 %s947_s28, 2 }
  0x28   : > { %s309_s18 = scalar_lea.vmem %s996_s4, %s683_s29  ;;  %s317_s16 = scalar_lea.vmem %s997_s5, %s685_s13 }
  0x29   : > { %v320_v7 = vld [vmem:[%s309_s18] sm:$0x3f] }
  0x2a   : > { %702 = vmatpush3.msk.msra.mxu0 %vm327_vm2, %v320_v7 }
  0x2b   : > { %704 = vmatmul.mubr.msk.f32.vlgmr.msra.gmra.mrb[0].mxu0 %vm323_vm3, %v322_v5  ;;  %718 = vmatprep.subr.bf16.mxu0 %v847_v8 }
  0x2c   : > { %721 = vmatpush3.bf16.msk.msra.mxu0 %vm720_vm5, %v719_v6  ;;  %710 = vmatprep.mubr.msk.f32.mxu0 %vm845_vm0, %v844_v2 }
  0x33   : > { %711 = vmatmul.mubr.msk.f32.vlgmr.msra.gmra.mrb[0].mxu0 %vm401_vm6, %v321_v9 }
 0x106   : > { %v475_v10 = vpop.f32.mrb[0].mxu0 }
 0x107   : > { %v479_v11 = vmax.f32 %v475_v10, 0.0  ;;  %v712_v12 = vpop.f32.mrb[1].mxu0 }
 0x109   : > { %714 = vmatpush3.msk.msra.mxu1 %vm327_vm2, %v479_v11 }
 0x10a   : > { %716 = vmatmul.mubr.msk.f32.vlgmr.msra.gmra.mrb[0].mxu1 %vm323_vm3, %v480_v13 }
 0x1dd   : > { %v553_v14 = vpop.f32.mrb[0].mxu1 }
 0x1de   : > { %v557_v15 = vadd.f32 %v553_v14, %v318_v3  ;;  %v717_v16 = vpop.f32.mrb[1].mxu1 }
 0x1e0   : > { %v558_v17 = vsub.f32 0.0, %v557_v15 }
 0x1e2   : > { %v559_v18 = vmul.f32 1.442695, %v558_v17 }
 0x1e4   : > { %784 = vpow2.f32 %v559_v18 }
 0x1ee   : > { %v785_v19 = vpop.eup %784 }
 0x1ef   : > { %v561_v20 = vadd.f32 1.0, %v785_v19 }
 0x1f1   : > { %786 = vrcp.f32 %v561_v20 }
 0x1fb   : > { %v787_v21 = vpop.eup %786 }
 0x1fc   : > { %v563_v22 = vmul.f32 %v787_v21, %v561_v20 }
 0x1fe   : > { %v564_v23 = vsub.f32 2.0, %v563_v22 }
 0x200   : > { %v565_v24 = vmul.f32 %v787_v21, %v564_v23 }
 0x202   : > { %566 = vst [vmem:[%s317_s16] sm:$0x7] %v565_v24 }
 0x203 PF: > { %s15_s24 = sadd.s32 1, %s842_s24   ;;  %s998_s18 = smov %s822_s19 }
 0x204   : > { %p12_p12 = scmp.ge.s32.totalorder %s15_s24, 6   ;;  %s999_s19 = smov %s929_s6 }
 0x205   : > { %s1000_s20 = smov %s834_s22  ;;  %s1001_s21 = smov %s838_s23 }
 0x206   : > { %s1002_s22 = smov %s1005_s25  ;;  %s1003_s23 = smov %s1009_s26 }
 0x207   :  { %14 = sbr.rel (!%p12_p12) target bundleno = 4 (0x4), region = 116 }

</bundles_post_ra>
